<compile_context>
chip_gen: v7x
topology: tpu7x:2x2x1
jax: 0.10.0
libtpu: 0.0.40
codegen_flags: <defaults>
</compile_context>

<pallas_src>
import functools

import jax
import jax.numpy as jnp
from jax.experimental import pallas as pl
from jax.experimental.pallas import tpu as pltpu


LANE = 128


def _round_up(x, m):
    return ((x + m - 1) // m) * m


def _vmem_limit_bytes():
    """Per-generation scoped-VMEM limit (~48 MiB on v7x, ~96 MiB on v5e/v6e)."""
    cap = 64 * 1024 * 1024  # conservative default = v7x physical VMEM
    try:
        info = pltpu.get_tpu_info()
        cap = int(getattr(info, "vmem_capacity_bytes", cap)) or cap
    except Exception:
        pass
    return int(min((cap * 3) // 4, 100 * 1024 * 1024))


# ------------------------------ Pallas kernels ------------------------------

def _conv_stats_kernel(w_ref, p_ref, y_ref, sum_ref, sq_ref):
    # w_ref:   (Cout, K)       conv weights (resident across the grid)
    # p_ref:   (K, tileM)      im2col patches, transposed (M on lanes)
    # y_ref:   (Cout, tileM)   conv output tile (lane-dense, streamed out)
    # sum_ref: (Cout, 1)       per-partition per-channel sum (resident accumulator)
    # sq_ref:  (Cout, 1)       per-partition per-channel sum of squares
    @pl.when(pl.program_id(1) == 0)
    def _init():
        sum_ref[...] = jnp.zeros_like(sum_ref)
        sq_ref[...] = jnp.zeros_like(sq_ref)

    y = jnp.dot(w_ref[...], p_ref[...], preferred_element_type=jnp.float32)
    y_ref[...] = y
    sum_ref[...] += jnp.sum(y, axis=1, keepdims=True)
    sq_ref[...] += jnp.sum(y * y, axis=1, keepdims=True)


def _bn_relu_nchw_kernel(scale_ref, shift_ref, y_ref, o_ref, *, ipt, hwp):
    # scale_ref/shift_ref: (Cout, 1)   gamma*rsqrt(var+eps) / beta - mean*scale
    # y_ref:               (Cout, ipt*hwp)  lane-dense conv tile
    # o_ref:               (ipt, Cout, hwp) NCHW-compatible output block
    for ii in range(ipt):  # static unroll; all slice starts are 128-aligned
        z = y_ref[:, ii * hwp:(ii + 1) * hwp] * scale_ref[...] + shift_ref[...]
        o_ref[ii] = jnp.maximum(z, 0.0)


# ------------------------------- glue (JAX) ---------------------------------

def _im2col_kt_per_image(x, kh, kw, stride, padding):
    """x: (N, Cin, H, W) -> P^T of shape (K, N, Ho*Wo), K = Cin*kh*kw (Cin-major)."""
    if padding:
        x = jnp.pad(x, ((0, 0), (0, 0), (padding, padding), (padding, padding)))
    N, C, H, W = x.shape
    Ho = (H - kh) // stride + 1
    Wo = (W - kw) // stride + 1
    cols = []
    for i in range(kh):
        for j in range(kw):
            cols.append(x[:, :, i:i + Ho * stride:stride, j:j + Wo * stride:stride])
    p = jnp.stack(cols, axis=0)          # (kh*kw, N, C, Ho, Wo)
    p = p.transpose(2, 0, 1, 3, 4)       # (C, kh*kw, N, Ho, Wo)  -> K is Cin-major
    p = p.reshape(C * kh * kw, N, Ho * Wo)
    return p, Ho, Wo


@functools.partial(jax.jit,
                   static_argnames=("stride", "padding", "eps", "vmem_limit"))
def _block_conv_impl(x, weight, gamma, beta, *, stride, padding, eps, vmem_limit):
    N, Cin, H, W = x.shape
    Cout, Cin_w, kh, kw = weight.shape
    assert Cin == Cin_w

    # ---- wrapper-side im2col (transposed; per-image column blocks) ----
    p3, Ho, Wo = _im2col_kt_per_image(x.astype(jnp.float32), kh, kw, stride, padding)
    K = Cin * kh * kw
    HW = Ho * Wo
    HWp = _round_up(HW, LANE)                 # lane-dense per-image column block

    # ---- tile sizing from the per-generation VMEM budget ----
    # phase-1 working set per column ~ 4B * 2(double-buffer) * (K patch + Cout y)
    bytes_per_col = 4 * 2 * (K + Cout)
    target_cols = max(LANE, (vmem_limit // 2) // bytes_per_col)
    ipt = int(max(1, min(N, target_cols // HWp, 128)))   # images per tile
    n_groups = -(-N // ipt)                               # cdiv
    num_parts = 2 if n_groups >= 2 else 1                 # v7x: split phase 1 over 2 TCs
    n_groups = _round_up(n_groups, num_parts)
    Np = n_groups * ipt
    tile_m = ipt * HWp
    Mp = Np * HWp
    M = N * HW                                            # true column count (for stats)
    inner = n_groups // num_parts

    # Padded columns are exact-zero patches -> zero conv rows -> contribute 0 to the
    # batch statistics (conv has no bias); we divide by the true M below.
    p_t = jnp.pad(p3, ((0, 0), (0, Np - N), (0, HWp - HW))).reshape(K, Mp)
    w_t = weight.reshape(Cout, K).astype(jnp.float32)

    # ---- phase 1: conv matmul + per-channel sum / sum-of-squares ----
    y_flat, sums, sqs = pl.pallas_call(
        _conv_stats_kernel,
        out_shape=(
            jax.ShapeDtypeStruct((Cout, Mp), jnp.float32),
            jax.ShapeDtypeStruct((num_parts, Cout, 1), jnp.float32),
            jax.ShapeDtypeStruct((num_parts, Cout, 1), jnp.float32),
        ),
        grid=(num_parts, inner),
        in_specs=[
            pl.BlockSpec((Cout, K), lambda c, i: (0, 0)),             # weights, resident
            pl.BlockSpec((K, tile_m), lambda c, i: (0, c * inner + i)),  # patch tiles
        ],
        out_specs=(
            pl.BlockSpec((Cout, tile_m), lambda c, i: (0, c * inner + i)),  # y, lane-dense
            pl.BlockSpec((None, Cout, 1), lambda c, i: (c, 0, 0)),    # per-partition sums
            pl.BlockSpec((None, Cout, 1), lambda c, i: (c, 0, 0)),    # per-partition sumsq
        ),
        compiler_params=pltpu.CompilerParams(
            dimension_semantics=("parallel", "arbitrary"),
            vmem_limit_bytes=vmem_limit),
        cost_estimate=pl.CostEstimate(
            flops=2 * Cout * K * Mp,
            transcendentals=0,
            bytes_accessed=4 * (K * Mp + Cout * K + Cout * Mp + 4 * Cout)),
    )(w_t, p_t)

    # ---- tiny per-channel BN math in plain JAX (Cout scalars) ----
    m_f = jnp.float32(M)
    sum_c = jnp.sum(sums[:, :, 0], axis=0)                 # (Cout,)
    sq_c = jnp.sum(sqs[:, :, 0], axis=0)                   # (Cout,)
    mean = sum_c / m_f
    var = jnp.maximum(sq_c / m_f - mean * mean, 0.0)        # biased (training-mode) var
    inv_std = jax.lax.rsqrt(var + eps)
    scale = (gamma.astype(jnp.float32) * inv_std).reshape(Cout, 1)
    shift = (beta.astype(jnp.float32) - mean * gamma.astype(jnp.float32) * inv_std
             ).reshape(Cout, 1)

    # ---- phase 2: fused scale/shift + ReLU, written in NCHW-compatible layout ----
    kern2 = functools.partial(_bn_relu_nchw_kernel, ipt=ipt, hwp=HWp)
    out3 = pl.pallas_call(
        kern2,
        out_shape=jax.ShapeDtypeStruct((Np, Cout, HWp), jnp.float32),
        grid=(n_groups,),
        in_specs=[
            pl.BlockSpec((Cout, 1), lambda g: (0, 0)),
            pl.BlockSpec((Cout, 1), lambda g: (0, 0)),
            pl.BlockSpec((Cout, tile_m), lambda g: (0, g)),
        ],
        out_specs=pl.BlockSpec((ipt, Cout, HWp), lambda g: (g, 0, 0)),
        compiler_params=pltpu.CompilerParams(
            dimension_semantics=("parallel",),
            vmem_limit_bytes=vmem_limit),
        cost_estimate=pl.CostEstimate(
            flops=2 * Cout * Mp,
            transcendentals=0,
            bytes_accessed=4 * (2 * Cout * Mp + 4 * Cout)),
    )(scale, shift, y_flat)

    # Only a slice (drop zero padding) + metadata reshape remain; no transpose pass.
    out = out3[:N, :, :HW].reshape(N, Cout, Ho, Wo)
    return out


def block_conv_forward(x, weight, gamma, beta, *, stride=1, padding=0, eps=1e-3):
    """Fused Conv2d(bias=False) + BatchNorm2d(training mode) + ReLU.

    x:      (N, Cin, H, W)  NCHW, float32
    weight: (Cout, Cin, kh, kw)
    gamma, beta: (Cout,)
    returns (N, Cout, Ho, Wo)
    """
    return _block_conv_impl(x, weight, gamma, beta, stride=stride, padding=padding,
                            eps=float(eps), vmem_limit=_vmem_limit_bytes())


# --------------------- plain-JAX reference (same math) ----------------------

def _reference(x, weight, gamma, beta, *, stride=1, padding=0, eps=1e-3):
    y = jax.lax.conv_general_dilated(
        x, weight, window_strides=(stride, stride),
        padding=[(padding, padding), (padding, padding)],
        dimension_numbers=("NCHW", "OIHW", "NCHW"),
        precision=jax.lax.Precision.HIGHEST)
    mean = jnp.mean(y, axis=(0, 2, 3), keepdims=True)
    var = jnp.mean((y - mean) ** 2, axis=(0, 2, 3), keepdims=True)
    z = (y - mean) * jax.lax.rsqrt(var + eps)
    z = z * gamma.reshape(1, -1, 1, 1) + beta.reshape(1, -1, 1, 1)
    return jnp.maximum(z, 0.0)


if __name__ == "__main__":
    # Small shapes consistent with the module: channelsIn=4, channelsOut=8, kernel=3
    N, Cin, H, W = 2, 4, 16, 16
    Cout, kh, kw = 8, 3, 3

    key = jax.random.PRNGKey(0)
    kx, kw_, kg, kb = jax.random.split(key, 4)
    x = jax.random.normal(kx, (N, Cin, H, W), dtype=jnp.float32)
    fan_in = Cin * kh * kw
    weight = jax.random.uniform(kw_, (Cout, Cin, kh, kw), dtype=jnp.float32,
                                minval=-1.0, maxval=1.0) / jnp.sqrt(fan_in)
    gamma = 1.0 + 0.1 * jax.random.normal(kg, (Cout,), dtype=jnp.float32)
    beta = 0.1 * jax.random.normal(kb, (Cout,), dtype=jnp.float32)

    out = jax.block_until_ready(
        block_conv_forward(x, weight, gamma, beta, stride=1, padding=0, eps=1e-3))

    ref = jax.block_until_ready(
        _reference(x, weight, gamma, beta, stride=1, padding=0, eps=1e-3))
    assert out.shape == (N, Cout, H - kh + 1, W - kw + 1), out.shape
    max_err = float(jnp.max(jnp.abs(out - ref)))
    assert jnp.allclose(out, ref, atol=2e-2, rtol=2e-2), max_err

    print("KERNEL_OK")
</pallas_src>

<mosaic_0001>
module attributes {stable_mosaic.version = 11 : i64} {
  func.func @_conv_stats_kernel(%arg0: i32, %arg1: i32, %arg2: memref<8x36xf32, #tpu.memory_space<vmem>>, %arg3: memref<36x512xf32, #tpu.memory_space<vmem>>, %arg4: memref<8x512xf32, #tpu.memory_space<vmem>>, %arg5: memref<1x8x1xf32, #tpu.memory_space<vmem>>, %arg6: memref<1x8x1xf32, #tpu.memory_space<vmem>>) attributes {dimension_semantics = [#tpu.dimension_semantics<parallel>, #tpu.dimension_semantics<arbitrary>], iteration_bounds = array<i64: 1, 1>, scalar_prefetch = 0 : i64, scratch_operands = 0 : i64, tpu.core_type = #tpu.core_type<tc>, window_params = [{pipeline_mode = #tpu.pipeline_mode<synchronous>, transform_indices = @transform_0, window_bounds = array<i64: 8, 36>}, {transform_indices = @transform_1, window_bounds = array<i64: 36, 512>}, {transform_indices = @transform_2, window_bounds = array<i64: 8, 512>}, {transform_indices = @transform_3, window_bounds = array<i64: 1, 8, 1>}, {transform_indices = @transform_4, window_bounds = array<i64: 1, 8, 1>}]} {
    %c0_i32 = arith.constant 0 : i32
    %0 = arith.cmpi eq, %arg1, %c0_i32 : i32
    %1 = arith.extui %0 : i1 to i32
    %c0_i32_0 = arith.constant 0 : i32
    %2 = arith.cmpi ne, %1, %c0_i32_0 : i32
    scf.if %2 {
      %cst_20 = arith.constant 0.000000e+00 : f32
      %24 = vector.broadcast %cst_20 : f32 to vector<8x1xf32>
      %c0_21 = arith.constant 0 : index
      %c0_22 = arith.constant 0 : index
      %c0_23 = arith.constant 0 : index
      %25 = vector.load %arg5[%c0_21, %c0_22, %c0_23] : memref<1x8x1xf32, #tpu.memory_space<vmem>>, vector<1x8x1xf32>
      %26 = vector.shape_cast %25 : vector<1x8x1xf32> to vector<8x1xf32>
      %27 = vector.shape_cast %24 : vector<8x1xf32> to vector<1x8x1xf32>
      tpu.vector_store %arg5[%c0_21, %c0_22, %c0_23], %27 {strides = array<i32>} : memref<1x8x1xf32, #tpu.memory_space<vmem>>, vector<1x8x1xf32>,
      %cst_24 = arith.constant 0.000000e+00 : f32
      %28 = vector.broadcast %cst_24 : f32 to vector<8x1xf32>
      %c0_25 = arith.constant 0 : index
      %c0_26 = arith.constant 0 : index
      %c0_27 = arith.constant 0 : index
      %29 = vector.load %arg6[%c0_25, %c0_26, %c0_27] : memref<1x8x1xf32, #tpu.memory_space<vmem>>, vector<1x8x1xf32>
      %30 = vector.shape_cast %29 : vector<1x8x1xf32> to vector<8x1xf32>
      %31 = vector.shape_cast %28 : vector<8x1xf32> to vector<1x8x1xf32>
      tpu.vector_store %arg6[%c0_25, %c0_26, %c0_27], %31 {strides = array<i32>} : memref<1x8x1xf32, #tpu.memory_space<vmem>>, vector<1x8x1xf32>,
    } else {
    }
    %c0 = arith.constant 0 : index
    %c0_1 = arith.constant 0 : index
    %3 = vector.load %arg2[%c0, %c0_1] : memref<8x36xf32, #tpu.memory_space<vmem>>, vector<8x36xf32>
    %c0_2 = arith.constant 0 : index
    %c0_3 = arith.constant 0 : index
    %4 = vector.load %arg3[%c0_2, %c0_3] : memref<36x512xf32, #tpu.memory_space<vmem>>, vector<36x512xf32>
    %cst = arith.constant dense<0.000000e+00> : vector<8x512xf32>
    %5 = tpu.matmul %3, %4, %cst {dimension_numbers = #tpu.dot_dimension_numbers<[1], [0], [0], [1], [0, 0, 1, 1], [], []>} : vector<8x36xf32>, vector<36x512xf32>, vector<8x512xf32> -> vector<8x512xf32>
    %c0_4 = arith.constant 0 : index
    %c0_5 = arith.constant 0 : index
    %6 = vector.load %arg4[%c0_4, %c0_5] : memref<8x512xf32, #tpu.memory_space<vmem>>, vector<8x512xf32>
    tpu.vector_store %arg4[%c0_4, %c0_5], %5 {strides = array<i32>} : memref<8x512xf32, #tpu.memory_space<vmem>>, vector<8x512xf32>,
    %c0_6 = arith.constant 0 : index
    %c0_7 = arith.constant 0 : index
    %c0_8 = arith.constant 0 : index
    %7 = vector.load %arg5[%c0_6, %c0_7, %c0_8] : memref<1x8x1xf32, #tpu.memory_space<vmem>>, vector<1x8x1xf32>
    %8 = vector.shape_cast %7 : vector<1x8x1xf32> to vector<8x1xf32>
    %cst_9 = arith.constant dense<0.000000e+00> : vector<8xf32>
    %9 = vector.multi_reduction <add>, %5, %cst_9 [1] : vector<8x512xf32> to vector<8xf32>
    %10 = vector.shape_cast %9 : vector<8xf32> to vector<8x1xf32>
    %11 = arith.addf %8, %10 : vector<8x1xf32>
    %c0_10 = arith.constant 0 : index
    %c0_11 = arith.constant 0 : index
    %c0_12 = arith.constant 0 : index
    %12 = vector.load %arg5[%c0_10, %c0_11, %c0_12] : memref<1x8x1xf32, #tpu.memory_space<vmem>>, vector<1x8x1xf32>
    %13 = vector.shape_cast %12 : vector<1x8x1xf32> to vector<8x1xf32>
    %14 = vector.shape_cast %11 : vector<8x1xf32> to vector<1x8x1xf32>
    tpu.vector_store %arg5[%c0_10, %c0_11, %c0_12], %14 {strides = array<i32>} : memref<1x8x1xf32, #tpu.memory_space<vmem>>, vector<1x8x1xf32>,
    %c0_13 = arith.constant 0 : index
    %c0_14 = arith.constant 0 : index
    %c0_15 = arith.constant 0 : index
    %15 = vector.load %arg6[%c0_13, %c0_14, %c0_15] : memref<1x8x1xf32, #tpu.memory_space<vmem>>, vector<1x8x1xf32>
    %16 = vector.shape_cast %15 : vector<1x8x1xf32> to vector<8x1xf32>
    %17 = arith.mulf %5, %5 : vector<8x512xf32>
    %cst_16 = arith.constant dense<0.000000e+00> : vector<8xf32>
    %18 = vector.multi_reduction <add>, %17, %cst_16 [1] : vector<8x512xf32> to vector<8xf32>
    %19 = vector.shape_cast %18 : vector<8xf32> to vector<8x1xf32>
    %20 = arith.addf %16, %19 : vector<8x1xf32>
    %c0_17 = arith.constant 0 : index
    %c0_18 = arith.constant 0 : index
    %c0_19 = arith.constant 0 : index
    %21 = vector.load %arg6[%c0_17, %c0_18, %c0_19] : memref<1x8x1xf32, #tpu.memory_space<vmem>>, vector<1x8x1xf32>
    %22 = vector.shape_cast %21 : vector<1x8x1xf32> to vector<8x1xf32>
    %23 = vector.shape_cast %20 : vector<8x1xf32> to vector<1x8x1xf32>
    tpu.vector_store %arg6[%c0_17, %c0_18, %c0_19], %23 {strides = array<i32>} : memref<1x8x1xf32, #tpu.memory_space<vmem>>, vector<1x8x1xf32>,
    return
  }
  func.func @transform_0(%arg0: i32, %arg1: i32) -> (i32, i32) {
    %c0_i32 = arith.constant 0 : i32
    %c0_i32_0 = arith.constant 0 : i32
    %c0_i32_1 = arith.constant 0 : i32
    return %c0_i32, %c0_i32_0 : i32, i32
  }
  func.func @transform_1(%arg0: i32, %arg1: i32) -> (i32, i32) {
    %c1_i32 = arith.constant 1 : i32
    %0 = arith.muli %arg0, %c1_i32 : i32
    %1 = arith.addi %0, %arg1 : i32
    %c0_i32 = arith.constant 0 : i32
    %c0_i32_0 = arith.constant 0 : i32
    return %c0_i32, %1 : i32, i32
  }
  func.func @transform_2(%arg0: i32, %arg1: i32) -> (i32, i32) {
    %c1_i32 = arith.constant 1 : i32
    %0 = arith.muli %arg0, %c1_i32 : i32
    %1 = arith.addi %0, %arg1 : i32
    %c0_i32 = arith.constant 0 : i32
    %c0_i32_0 = arith.constant 0 : i32
    return %c0_i32, %1 : i32, i32
  }
  func.func @transform_3(%arg0: i32, %arg1: i32) -> (i32, i32, i32) {
    %c0_i32 = arith.constant 0 : i32
    %c0_i32_0 = arith.constant 0 : i32
    %c0_i32_1 = arith.constant 0 : i32
    return %arg0, %c0_i32, %c0_i32_0 : i32, i32, i32
  }
  func.func @transform_4(%arg0: i32, %arg1: i32) -> (i32, i32, i32) {
    %c0_i32 = arith.constant 0 : i32
    %c0_i32_0 = arith.constant 0 : i32
    %c0_i32_1 = arith.constant 0 : i32
    return %arg0, %c0_i32, %c0_i32_0 : i32, i32, i32
  }
}

module attributes {stable_mosaic.version = 11 : i64} {
  func.func @_bn_relu_nchw_kernel(%arg0: i32, %arg1: memref<8x1xf32, #tpu.memory_space<vmem>>, %arg2: memref<8x1xf32, #tpu.memory_space<vmem>>, %arg3: memref<8x512xf32, #tpu.memory_space<vmem>>, %arg4: memref<2x8x256xf32, #tpu.memory_space<vmem>>) attributes {dimension_semantics = [#tpu.dimension_semantics<parallel>], iteration_bounds = array<i64: 1>, scalar_prefetch = 0 : i64, scratch_operands = 0 : i64, tpu.core_type = #tpu.core_type<tc>, window_params = [{pipeline_mode = #tpu.pipeline_mode<synchronous>, transform_indices = @transform_0, window_bounds = array<i64: 8, 1>}, {pipeline_mode = #tpu.pipeline_mode<synchronous>, transform_indices = @transform_1, window_bounds = array<i64: 8, 1>}, {transform_indices = @transform_2, window_bounds = array<i64: 8, 512>}, {transform_indices = @transform_3, window_bounds = array<i64: 2, 8, 256>}]} {
    %c0 = arith.constant 0 : index
    %c0_0 = arith.constant 0 : index
    %0 = vector.load %arg3[%c0, %c0_0] : memref<8x512xf32, #tpu.memory_space<vmem>>, vector<8x256xf32>
    %c0_1 = arith.constant 0 : index
    %c0_2 = arith.constant 0 : index
    %1 = vector.load %arg1[%c0_1, %c0_2] : memref<8x1xf32, #tpu.memory_space<vmem>>, vector<8x1xf32>
    %2 = vector.broadcast %1 : vector<8x1xf32> to vector<8x256xf32>
    %3 = arith.mulf %0, %2 : vector<8x256xf32>
    %c0_3 = arith.constant 0 : index
    %c0_4 = arith.constant 0 : index
    %4 = vector.load %arg2[%c0_3, %c0_4] : memref<8x1xf32, #tpu.memory_space<vmem>>, vector<8x1xf32>
    %5 = vector.broadcast %4 : vector<8x1xf32> to vector<8x256xf32>
    %6 = arith.addf %3, %5 : vector<8x256xf32>
    %cst = arith.constant 0.000000e+00 : f32
    %7 = vector.broadcast %cst : f32 to vector<8x256xf32>
    %8 = arith.maximumf %6, %7 : vector<8x256xf32>
    %c0_5 = arith.constant 0 : index
    %c0_6 = arith.constant 0 : index
    %c0_7 = arith.constant 0 : index
    %9 = vector.load %arg4[%c0_5, %c0_6, %c0_7] : memref<2x8x256xf32, #tpu.memory_space<vmem>>, vector<1x8x256xf32>
    %10 = vector.shape_cast %9 : vector<1x8x256xf32> to vector<8x256xf32>
    %11 = vector.shape_cast %8 : vector<8x256xf32> to vector<1x8x256xf32>
    tpu.vector_store %arg4[%c0_5, %c0_6, %c0_7], %11 {strides = array<i32>} : memref<2x8x256xf32, #tpu.memory_space<vmem>>, vector<1x8x256xf32>,
    %c0_8 = arith.constant 0 : index
    %c256 = arith.constant 256 : index
    %12 = vector.load %arg3[%c0_8, %c256] : memref<8x512xf32, #tpu.memory_space<vmem>>, vector<8x256xf32>
    %c0_9 = arith.constant 0 : index
    %c0_10 = arith.constant 0 : index
    %13 = vector.load %arg1[%c0_9, %c0_10] : memref<8x1xf32, #tpu.memory_space<vmem>>, vector<8x1xf32>
    %14 = vector.broadcast %13 : vector<8x1xf32> to vector<8x256xf32>
    %15 = arith.mulf %12, %14 : vector<8x256xf32>
    %c0_11 = arith.constant 0 : index
    %c0_12 = arith.constant 0 : index
    %16 = vector.load %arg2[%c0_11, %c0_12] : memref<8x1xf32, #tpu.memory_space<vmem>>, vector<8x1xf32>
    %17 = vector.broadcast %16 : vector<8x1xf32> to vector<8x256xf32>
    %18 = arith.addf %15, %17 : vector<8x256xf32>
    %cst_13 = arith.constant 0.000000e+00 : f32
    %19 = vector.broadcast %cst_13 : f32 to vector<8x256xf32>
    %20 = arith.maximumf %18, %19 : vector<8x256xf32>
    %c1 = arith.constant 1 : index
    %c0_14 = arith.constant 0 : index
    %c0_15 = arith.constant 0 : index
    %21 = vector.load %arg4[%c1, %c0_14, %c0_15] : memref<2x8x256xf32, #tpu.memory_space<vmem>>, vector<1x8x256xf32>
    %22 = vector.shape_cast %21 : vector<1x8x256xf32> to vector<8x256xf32>
    %23 = vector.shape_cast %20 : vector<8x256xf32> to vector<1x8x256xf32>
    tpu.vector_store %arg4[%c1, %c0_14, %c0_15], %23 {strides = array<i32>} : memref<2x8x256xf32, #tpu.memory_space<vmem>>, vector<1x8x256xf32>,
    return
  }
  func.func @transform_0(%arg0: i32) -> (i32, i32) {
    %c0_i32 = arith.constant 0 : i32
    %c0_i32_0 = arith.constant 0 : i32
    %c0_i32_1 = arith.constant 0 : i32
    return %c0_i32, %c0_i32_0 : i32, i32
  }
  func.func @transform_1(%arg0: i32) -> (i32, i32) {
    %c0_i32 = arith.constant 0 : i32
    %c0_i32_0 = arith.constant 0 : i32
    %c0_i32_1 = arith.constant 0 : i32
    return %c0_i32, %c0_i32_0 : i32, i32
  }
  func.func @transform_2(%arg0: i32) -> (i32, i32) {
    %c0_i32 = arith.constant 0 : i32
    %c0_i32_0 = arith.constant 0 : i32
    return %c0_i32, %arg0 : i32, i32
  }
  func.func @transform_3(%arg0: i32) -> (i32, i32, i32) {
    %c0_i32 = arith.constant 0 : i32
    %c0_i32_0 = arith.constant 0 : i32
    %c0_i32_1 = arith.constant 0 : i32
    return %arg0, %c0_i32, %c0_i32_0 : i32, i32, i32
  }
}

</mosaic_0001>

<bundles_post_ra>
// kernel: _block_conv_impl.3
= control target key start
LH: loop header
LB: loop body
LE: loop exit
PB: predicated region body
PF: predicated region fallthrough
CT: control target
= control target key end

     0   :  { %v68_v0 = vmov 0   ;;  %s119_s1 = inlined_call_operand.vmem [shape: f32[8,1], index: 1, kind: input, shape index: {}]   ;;  %s120_s0 = inlined_call_operand.vmem [shape: f32[8,1], index: 0, kind: input, shape index: {}]   ;;  %s121_s2 = inlined_call_operand.vmem [shape: f32[8,512], index: 2, kind: input, shape index: {}]   ;;  %s122_s3 = inlined_call_operand.vmem [shape: f32[2,8,256], index: 3, kind: output, shape index: {}]  }
   0x1   :  { %67 = vset.pattern.permute.xlu1 %v68_v0  ;;  %66 = vset.pattern.permute.xlu0 %v68_v0  ;;  %v24_v1 = vld [vmem:[%s119_s1] sm:$0xff]  ;;  %v15_v4 = vld [vmem:[%s121_s2 + $0x8] sm:$0xff]  ;;  %v36_v9 = vld [vmem:[%s121_s2 + $0x10] sm:$0xff] }
   0x2   :  { %v16_v2 = vld [vmem:[%s120_s0] sm:$0xff]  ;;  %27 = vperm.xlu1 %67, %v24_v1   ;;  %v37_v10 = vld [vmem:[%s121_s2 + $0x18] sm:$0xff] }
   0x3   :  { %19 = vperm.xlu0 %66, %v16_v2   ;;  %v14_v3 = vld [vmem:[%s121_s2] sm:$0xff] }
   0x6   :  { %49 = vperm.xlu1 %67, %v24_v1  }
   0x7   :  { %41 = vperm.xlu0 %66, %v16_v2  }
  0x81   :  { %v28_v5 = vpop.permute.xlu1 %27 }
  0x82   :  { %v20_v6 = vpop.permute.xlu0 %19 }
  0x83   :  { %v22_v7 = vmul.f32 %v20_v6, %v14_v3  ;;  %v23_v8 = vmul.f32 %v20_v6, %v15_v4 }
  0x85   :  { %v30_v11 = vadd.f32 %v28_v5, %v22_v7  ;;  %v31_v12 = vadd.f32 %v28_v5, %v23_v8  ;;  %v50_v18 = vpop.permute.xlu1 %49 }
  0x86   :  { %v42_v13 = vpop.permute.xlu0 %41 }
  0x87   :  { %v32_v14 = vmax.f32 %v30_v11, 0.0  ;;  %v33_v15 = vmax.f32 %v31_v12, 0.0  ;;  %v44_v16 = vmul.f32 %v42_v13, %v36_v9  ;;  %v45_v17 = vmul.f32 %v42_v13, %v37_v10 }
  0x89   :  { %34 = vst [vmem:[%s122_s3] sm:$0xff] %v32_v14  ;;  %35 = vst [vmem:[%s122_s3 + $0x8] sm:$0xff] %v33_v15  ;;  %v52_v19 = vadd.f32 %v50_v18, %v44_v16  ;;  %v53_v20 = vadd.f32 %v50_v18, %v45_v17 }
  0x8b   :  { %v54_v21 = vmax.f32 %v52_v19, 0.0  ;;  %v55_v22 = vmax.f32 %v53_v20, 0.0 }
  0x8d   :  { %63 = vst [vmem:[%s122_s3 + $0x10] sm:$0xff] %v54_v21  ;;  %64 = vst [vmem:[%s122_s3 + $0x18] sm:$0xff] %v55_v22 }

// kernel: _block_conv_impl.2
= control target key start
LH: loop header
LB: loop body
LE: loop exit
PB: predicated region body
PF: predicated region fallthrough
CT: control target
= control target key end

     0   :  { %v325_v3 = vmov 0.0   ;;  %vm82_vm0 = vcmask 1043456   ;;  %vm78_vm1 = vcmask 293888   ;;  %vm54_vm2 = vcmask 7168   ;;  %s452_s1 = inlined_call_operand.vmem [shape: f32[36,512], index: 1, kind: input, shape index: {}]   ;;  %s453_s0 = inlined_call_operand.vmem [shape: f32[8,36], index: 0, kind: input, shape index: {}]   ;;  %s454_s3 = inlined_call_operand.vmem [shape: f32[1,8,1], index: 3, kind: output, shape index: {1}]   ;;  %s455_s2 = inlined_call_operand.vmem [shape: f32[8,512], index: 2, kind: output, shape index: {0}]   ;;  %s456_s4 = inlined_call_operand.vmem [shape: f32[1,8,1], index: 4, kind: output, shape index: {2}]  }
   0x1   :  { %v59_v0 = vld [vmem:[%s452_s1 + $0x8] sm:$0xff]  ;;  %v58_v2 = vld [vmem:[%s452_s1] sm:$0xff]  ;;  %159 = vmatprep.mubr.f32.mxu0 %v325_v3  ;;  %230 = vmatprep.mubr.f32.mxu1 %v325_v3  ;;  %v61_v6 = vld [vmem:[%s452_s1 + $0x18] sm:$0xff]  ;;  %55 = vst.msk [vmem:[%s454_s3] sm:$0xff] %vm54_vm2, %v325_v3 }
   0x2   :  { %v63_v1 = vld [vmem:[%s452_s1 + $0x28] sm:$0xff]  ;;  %v62_v5 = vld [vmem:[%s452_s1 + $0x20] sm:$0xff]  ;;  %v65_v7 = vld [vmem:[%s452_s1 + $0x38] sm:$0xff]  ;;  %56 = vst.msk [vmem:[%s456_s4] sm:$0xff] %vm54_vm2, %v325_v3 }
   0x3   :  { %v308_v4 = vpack.c.bf16 %v63_v1, %v59_v0  ;;  %v310_v8 = vpack.c.bf16 %v62_v5, %v58_v2  ;;  %v316_v9 = vpack.c.bf16 %v65_v7, %v61_v6  ;;  %v60_v10 = vld [vmem:[%s452_s1 + $0x10] sm:$0xff]  ;;  %v67_v12 = vld [vmem:[%s452_s1 + $0x48] sm:$0xff]  ;;  %v66_v15 = vld [vmem:[%s452_s1 + $0x40] sm:$0xff] }
   0x4   :  { %v64_v11 = vld [vmem:[%s452_s1 + $0x30] sm:$0xff]  ;;  %v71_v14 = vld [vmem:[%s452_s1 + $0x68] sm:$0xff]  ;;  %v70_v16 = vld [vmem:[%s452_s1 + $0x60] sm:$0xff] }
   0x5   :  { %309 = vmatprep.subr.bf16.mxu0 %v308_v4  ;;  %v318_v13 = vpack.c.bf16 %v64_v11, %v60_v10  ;;  %317 = vmatprep.subr.bf16.mxu1 %v316_v9  ;;  %v312_v17 = vpack.c.bf16 %v71_v14, %v67_v12  ;;  %v314_v18 = vpack.c.bf16 %v70_v16, %v66_v15  ;;  %v69_v19 = vld [vmem:[%s452_s1 + $0x58] sm:$0xff]  ;;  %v68_v21 = vld [vmem:[%s452_s1 + $0x50] sm:$0xff]  ;;  %v75_v25 = vld [vmem:[%s452_s1 + $0x88] sm:$0xf] }
   0x6   :  { %311 = vmatpush1.bf16.msra.mxu0 %v310_v8  ;;  %v73_v20 = vld [vmem:[%s452_s1 + $0x78] sm:$0xff]  ;;  %v72_v23 = vld [vmem:[%s452_s1 + $0x70] sm:$0xff]  ;;  %v74_v27 = vld [vmem:[%s452_s1 + $0x80] sm:$0xf] }
   0x7   :  { %319 = vmatpush1.bf16.msra.mxu1 %v318_v13  ;;  %v320_v22 = vpack.c.bf16 %v73_v20, %v69_v19  ;;  %313 = vmatprep.subr.bf16.mxu0 %v312_v17  ;;  %v322_v24 = vpack.c.bf16 %v72_v23, %v68_v21  ;;  %v77_v26 = vld [vmem:[%s452_s1 + $0x98] sm:$0xf]  ;;  %v57_v28 = vld [vmem:[%s453_s0] sm:$0xff]  ;;  %v76_v29 = vld [vmem:[%s452_s1 + $0x90] sm:$0xf] }
   0x8   :  { %v241_v44 = vld [vmem:[%s454_s3] sm:$0xff] }
   0x9   :  { %321 = vmatprep.subr.bf16.mxu1 %v320_v22  ;;  %v250_v47 = vld [vmem:[%s456_s4] sm:$0xff] }
   0xa   :  { %315 = vmatpush1.bf16.msra.mxu0 %v314_v18 }
   0xb   :  { %323 = vmatpush1.bf16.msra.mxu1 %v322_v24  ;;  %302 = vmatprep.subr.msk.mxu0 %vm82_vm0, %v75_v25 }
   0xc   :  { %305 = vmatprep.subr.msk.mxu1 %vm82_vm0, %v77_v26 }
   0xe   :  { %303 = vmatpush1.msk.msra.mxu0 %vm82_vm0, %v74_v27 }
   0xf   :  { %304 = vmatmul.mubr.msk.f32.vlgmr.msra.gmra.mrb[0].mxu0 %vm78_vm1, %v57_v28  ;;  %306 = vmatpush1.msk.msra.mxu1 %vm82_vm0, %v76_v29 }
  0x10   :  { %307 = vmatmul.mubr.msk.f32.vlgmr.msra.gmra.mrb[0].mxu1 %vm78_vm1, %v57_v28 }
  0xe2   :  { %v161_v30 = vpop.f32.mrb[0].mxu0 }
  0xe3   :  { %237 = vst [vmem:[%s455_s2] sm:$0xff] %v161_v30  ;;  %v251_v31 = vmul.f32 %v161_v30, %v161_v30  ;;  %v163_v32 = vpop.f32.mrb[1].mxu0  ;;  %v232_v33 = vpop.f32.mrb[0].mxu1 }
  0xe4   :  { %238 = vst [vmem:[%s455_s2 + $0x8] sm:$0xff] %v163_v32  ;;  %v242_v34 = vadd.f32 %v163_v32, %v161_v30  ;;  %v252_v35 = vmul.f32 %v163_v32, %v163_v32  ;;  %239 = vst [vmem:[%s455_s2 + $0x10] sm:$0xff] %v232_v33  ;;  %v253_v36 = vmul.f32 %v232_v33, %v232_v33  ;;  %v234_v37 = vpop.f32.mrb[1].mxu1 }
  0xe5   :  { %240 = vst [vmem:[%s455_s2 + $0x18] sm:$0xff] %v234_v37  ;;  %v254_v40 = vmul.f32 %v234_v37, %v234_v37 }
  0xe6   :  { %v255_v38 = vadd.f32 %v252_v35, %v251_v31  ;;  %v243_v39 = vadd.f32 %v242_v34, %v232_v33 }
  0xe8   :  { %v244_v41 = vadd.f32 %v243_v39, %v234_v37  ;;  %v256_v42 = vadd.f32 %v255_v38, %v253_v36 }
  0xea   :  { %245 = vadd.xlane.f32.xlu0 %v244_v41  ;;  %v257_v43 = vadd.f32 %v256_v42, %v254_v40 }
  0xee   :  { %258 = vadd.xlane.f32.xlu0 %v257_v43 }
 0x177   :  { %v246_v45 = vpop.xlane.xlu0 %245 }
 0x178   :  { %v247_v46 = vadd.f32 %v246_v45, %v241_v44 }
 0x17a   :  { %249 = vst.msk [vmem:[%s454_s3] sm:$0xff] %vm54_vm2, %v247_v46 }
 0x17b   :  { %v259_v48 = vpop.xlane.xlu0 %258 }
 0x17c   :  { %v260_v49 = vadd.f32 %v259_v48, %v250_v47 }
 0x17e   :  { %261 = vst.msk [vmem:[%s456_s4] sm:$0xff] %vm54_vm2, %v260_v49 }

</bundles_post_ra>
